<compile_context>
chip_gen: v7x
topology: tpu7x:2x2x1
jax: 0.10.0
libtpu: 0.0.40
codegen_flags: <defaults>
</compile_context>

<pallas_src>
from functools import partial

import jax
import jax.numpy as jnp
from jax.experimental import pallas as pl
from jax.experimental.pallas import tpu as pltpu


# --------------------------------------------------------------------------------------
# Kernel
# --------------------------------------------------------------------------------------
def _attention_kernel(h_ref, e_ref, wh_ref, we_ref, b_ref, v_ref, ctx_ref, aw_ref,
                      *, s_valid, mm_dtype):
    # h_ref:  (TB, H)        hidden states for this batch block (input dtype)
    # e_ref:  (TB, S_pad, H) encoder outputs for this batch block (input dtype)
    # wh_ref: (H, H)         weight applied to the hidden half of the concat (mm_dtype)
    # we_ref: (H, H)         weight applied to the encoder half of the concat (mm_dtype)
    # b_ref:  (1, H)         linear bias (f32)
    # v_ref:  (1, H)         scoring vector v (f32)
    # ctx_ref:(TB, H)        output context (f32)
    # aw_ref: (TB, S_pad)    output attention weights (f32)
    tb, s_pad, hdim = e_ref.shape

    h = h_ref[...]                  # (TB, H)
    e = e_ref[...]                  # (TB, S_pad, H)
    wh = wh_ref[...]                # (H, H)
    we = we_ref[...]                # (H, H)
    bias = b_ref[...]               # (1, H) f32
    v = v_ref[...]                  # (1, H) f32

    # Hidden contribution: one (TB, H) @ (H, H) MXU op per block (amortized over S).
    hw = jnp.dot(h.astype(mm_dtype), wh, preferred_element_type=jnp.float32) + bias  # (TB, H)

    # Encoder contribution: flatten batch*seq so the MXU sees M = TB*S rows.
    # S_pad is sublane-aligned in the wrapper, so this reshape is a free re-view;
    # the matmul-dtype cast happens here (after the reshape), never in the wrapper.
    e_mm = e.reshape(tb * s_pad, hdim).astype(mm_dtype)
    ew = jnp.dot(e_mm, we, preferred_element_type=jnp.float32).reshape(tb, s_pad, hdim)

    # energy = tanh([h, e] @ W.T + b) == tanh(h @ Wh + e @ We + b), h broadcast over S.
    energy = jnp.tanh(ew + hw[:, None, :])                          # (TB, S_pad, H) f32

    # scores[b, t] = v . energy[b, t]  -- lane reduction over H, lane-dense (TB, S_pad).
    scores = jnp.sum(energy * v[None, :, :], axis=-1)               # (TB, S_pad) f32

    # Mask padded key positions (only generated when S was not sublane-aligned).
    if s_valid != s_pad:
        lane = jax.lax.broadcasted_iota(jnp.int32, scores.shape, 1)
        scores = jnp.where(lane < s_valid, scores, -jnp.inf)

    # Softmax along the lane (sequence) axis.
    m = jnp.max(scores, axis=-1, keepdims=True)
    p = jnp.exp(scores - m)
    aw = p / jnp.sum(p, axis=-1, keepdims=True)                     # (TB, S_pad) f32

    # context = attn_weights @ encoder_outputs done on the VPU/XLU (multiply + sublane
    # reduction) instead of TB separate M=1 MXU matmuls -> overlaps with the MXU work.
    ctx = jnp.sum(e.astype(jnp.float32) * aw[:, :, None], axis=1)   # (TB, H) f32

    ctx_ref[...] = ctx.astype(ctx_ref.dtype)
    aw_ref[...] = aw.astype(aw_ref.dtype)


# --------------------------------------------------------------------------------------
# Tile / VMEM heuristics
# --------------------------------------------------------------------------------------
def _vmem_limit_bytes():
    """Generation-aware VMEM limit: ~3/4 of physical VMEM, capped at 100 MiB.
    ~48 MiB on v7x (64 MiB/TC), ~96 MiB on v5e/v6e (128 MiB)."""
    cap = None
    try:
        cap = getattr(pltpu.get_tpu_info(), "vmem_capacity_bytes", None)
    except Exception:
        cap = None
    if not cap:
        cap = 64 << 20  # conservative default: v7x per-TensorCore VMEM
    return int(min(cap * 3 // 4, 100 << 20))


def _choose_batch_tile(B, s_pad, H, in_bytes, tile_budget_bytes):
    """Byte-budget-driven batch tile: double-buffered encoder slab + f32 energy/context
    temporaries must fit `tile_budget_bytes`; prefer a tile that divides B (no pad copy)."""
    slab_row = s_pad * H * in_bytes          # encoder bytes per batch row (one buffer)
    temp_row = s_pad * H * 16                # f32 ew/energy + cast copy + ctx-product temps
    per_row = 2 * slab_row + temp_row + 8 * (H + s_pad)
    tb_budget = max(1, tile_budget_bytes // per_row)
    tb_target = max(1, (8 << 20) // max(slab_row, 1))   # cap enc buffer at ~8 MiB per copy
    tb_max = max(1, min(tb_budget, tb_target))
    if B <= tb_max:
        # Keep >=2 grid steps when the batch allows it so the "parallel" batch axis can be
        # split across v7x's two TensorCores (costs only ~0.35us/step on single-TC chips).
        if B >= 16 and B % 16 == 0:
            return B // 2
        return B
    tb_max = max(8, (tb_max // 8) * 8)       # sublane-aligned tile (tb < B)
    for tb in range(tb_max, 7, -8):          # prefer a divisor of B -> no wrapper pad
        if B % tb == 0:
            return tb
    return tb_max                            # fallback: pad + slice


# --------------------------------------------------------------------------------------
# Wrapper
# --------------------------------------------------------------------------------------
def attention_pallas(hidden, encoder_outputs, W, b, v, *,
                     batch_tile=None, matmul_dtype=None):
    """hidden: (B, H), encoder_outputs: (B, S, H), W: (H, 2H), b: (H,), v: (H,).

    Pass bf16 hidden/encoder_outputs from the producer for the true bf16 path (halved
    encoder DMA + bf16 MXU); softmax / accumulation stay in f32 regardless.
    """
    B, H = hidden.shape
    _, S, _ = encoder_outputs.shape

    in_dtype = encoder_outputs.dtype
    if matmul_dtype is None:
        matmul_dtype = jnp.bfloat16 if in_dtype == jnp.bfloat16 else jnp.float32
    matmul_dtype = jnp.dtype(matmul_dtype)
    in_bytes = jnp.dtype(in_dtype).itemsize
    mm_bytes = matmul_dtype.itemsize

    # Split the concat-Linear into two (H, H) matmuls (nn.Linear computes x @ W.T).
    wh = W[:, :H].T.astype(matmul_dtype)     # applied to the hidden part
    we = W[:, H:].T.astype(matmul_dtype)     # applied to the encoder part
    b2 = b.reshape(1, H).astype(jnp.float32)
    v2 = v.reshape(1, H).astype(jnp.float32)

    # Sublane-align S so the in-kernel (TB,S,H)->(TB*S,H) flatten is a free re-view
    # (no VMEM relayout copy per grid step). f32 needs S%8==0, packed dtypes S%16==0.
    s_align = 8 if in_bytes >= 4 else 16
    s_pad = -(-S // s_align) * s_align
    enc = encoder_outputs
    if s_pad != S:
        # One-off HBM copy; prefer producing S already aligned. Padded positions are
        # masked to -inf inside the kernel so the softmax is unaffected.
        enc = jnp.pad(enc, ((0, 0), (0, s_pad - S), (0, 0)))

    vmem_limit = _vmem_limit_bytes()
    fixed = 2 * H * H * mm_bytes + 8 * H                     # single-buffered weights + bias/v
    tile_budget = max(int(vmem_limit * 0.7) - fixed, 1 << 20)

    if batch_tile is not None:
        tb = min(int(batch_tile), B)
        if tb < B:
            tb = max(8, -(-tb // 8) * 8)
    else:
        tb = _choose_batch_tile(B, s_pad, H, in_bytes, tile_budget)

    b_pad = -(-B // tb) * tb
    hid = hidden
    if b_pad != B:
        # Fallback only: the chooser prefers a tile dividing B, so this full-tensor pad
        # copy is normally skipped. Padded rows are sliced off below.
        hid = jnp.pad(hid, ((0, b_pad - B), (0, 0)))
        enc = jnp.pad(enc, ((0, b_pad - B), (0, 0), (0, 0)))

    grid = (b_pad // tb,)

    flops = 2 * b_pad * s_pad * H * H + 2 * b_pad * H * H + 4 * b_pad * s_pad * H
    bytes_accessed = (b_pad * s_pad * H * in_bytes + b_pad * H * in_bytes
                      + 2 * H * H * mm_bytes + b_pad * H * 4 + b_pad * s_pad * 4)

    kernel = partial(_attention_kernel, s_valid=S, mm_dtype=matmul_dtype)

    ctx, aw = pl.pallas_call(
        kernel,
        out_shape=(
            jax.ShapeDtypeStruct((b_pad, H), jnp.float32),
            jax.ShapeDtypeStruct((b_pad, s_pad), jnp.float32),
        ),
        grid_spec=pltpu.PrefetchScalarGridSpec(
            num_scalar_prefetch=0,
            grid=grid,
            in_specs=[
                pl.BlockSpec((tb, H), lambda i: (i, 0)),            # hidden block
                pl.BlockSpec((tb, s_pad, H), lambda i: (i, 0, 0)),  # encoder block
                # Grid-invariant params: single-buffer them (no point double-buffering a
                # constant index_map); reclaimed VMEM goes to the encoder tile.
                pl.BlockSpec((H, H), lambda i: (0, 0), pipeline_mode=pl.Buffered(1)),
                pl.BlockSpec((H, H), lambda i: (0, 0), pipeline_mode=pl.Buffered(1)),
                pl.BlockSpec((1, H), lambda i: (0, 0), pipeline_mode=pl.Buffered(1)),
                pl.BlockSpec((1, H), lambda i: (0, 0), pipeline_mode=pl.Buffered(1)),
            ],
            out_specs=[
                pl.BlockSpec((tb, H), lambda i: (i, 0)),            # context (lane-dense)
                pl.BlockSpec((tb, s_pad), lambda i: (i, 0)),        # attn weights (lane-dense)
            ],
        ),
        compiler_params=pltpu.CompilerParams(
            # Parallel batch axis -> Mosaic can shard grid steps across v7x's two TCs.
            dimension_semantics=("parallel",),
            vmem_limit_bytes=vmem_limit,
        ),
        cost_estimate=pl.CostEstimate(
            flops=int(flops),
            transcendentals=int(b_pad * s_pad * (H + 1)),
            bytes_accessed=int(bytes_accessed),
        ),
    )(hid, enc, wh, we, b2, v2)

    return ctx[:B], aw[:B, :S]


# --------------------------------------------------------------------------------------
# Pure-JAX reference (mirrors the PyTorch module exactly)
# --------------------------------------------------------------------------------------
def attention_ref(hidden, encoder_outputs, W, b, v):
    B, S, H = encoder_outputs.shape
    h_tiled = jnp.broadcast_to(hidden[:, None, :], (B, S, H))
    cat = jnp.concatenate([h_tiled, encoder_outputs], axis=2)      # (B, S, 2H)
    energy = jnp.tanh(jnp.einsum("bsk,hk->bsh", cat, W) + b)       # (B, S, H)
    scores = jnp.einsum("h,bsh->bs", v, energy)                    # (B, S)
    aw = jax.nn.softmax(scores, axis=1)                            # (B, S)
    ctx = jnp.einsum("bs,bsh->bh", aw, encoder_outputs)            # (B, H)
    return ctx, aw


def _make_inputs(key, B, S, H):
    k_hid, k_enc, k_w, k_b, k_v = jax.random.split(key, 5)
    hidden = jax.random.normal(k_hid, (B, H), dtype=jnp.float32)
    encoder_outputs = jax.random.normal(k_enc, (B, S, H), dtype=jnp.float32)
    lin_bound = 1.0 / (2 * H) ** 0.5
    W = jax.random.uniform(k_w, (H, 2 * H), jnp.float32, -lin_bound, lin_bound)
    b = jax.random.uniform(k_b, (H,), jnp.float32, -lin_bound, lin_bound)
    stdv = 1.0 / H ** 0.5
    v = jax.random.uniform(k_v, (H,), jnp.float32, -stdv, stdv)
    return hidden, encoder_outputs, W, b, v


if __name__ == "__main__":
    key = jax.random.PRNGKey(0)
    k1, k2, k3 = jax.random.split(key, 3)

    # Canonical small test (single grid step, whole batch in one block, exact f32 path).
    B, S, H = 2, 8, 32
    hidden, enc, W, bb, vv = _make_inputs(k1, B, S, H)
    ctx, aw = attention_pallas(hidden, enc, W, bb, vv)
    jax.block_until_ready((ctx, aw))
    ctx_r, aw_r = attention_ref(hidden, enc, W, bb, vv)
    assert ctx.shape == (B, H) and aw.shape == (B, S)
    assert jnp.allclose(ctx, ctx_r, atol=1e-5, rtol=1e-5)
    assert jnp.allclose(aw, aw_r, atol=1e-5, rtol=1e-5)

    # Multi-step grid + batch-padding fallback path.
    B2, S2, H2 = 12, 8, 32
    hidden2, enc2, W2, bb2, vv2 = _make_inputs(k2, B2, S2, H2)
    ctx2, aw2 = attention_pallas(hidden2, enc2, W2, bb2, vv2, batch_tile=8)
    jax.block_until_ready((ctx2, aw2))
    ctx2_r, aw2_r = attention_ref(hidden2, enc2, W2, bb2, vv2)
    assert ctx2.shape == (B2, H2) and aw2.shape == (B2, S2)
    assert jnp.allclose(ctx2, ctx2_r, atol=1e-5, rtol=1e-5)
    assert jnp.allclose(aw2, aw2_r, atol=1e-5, rtol=1e-5)

    # Unaligned sequence length -> wrapper pads S, kernel masks padded key positions.
    B3, S3, H3 = 4, 10, 32
    hidden3, enc3, W3, bb3, vv3 = _make_inputs(k3, B3, S3, H3)
    ctx3, aw3 = attention_pallas(hidden3, enc3, W3, bb3, vv3)
    jax.block_until_ready((ctx3, aw3))
    ctx3_r, aw3_r = attention_ref(hidden3, enc3, W3, bb3, vv3)
    assert ctx3.shape == (B3, H3) and aw3.shape == (B3, S3)
    assert jnp.allclose(ctx3, ctx3_r, atol=1e-5, rtol=1e-5)
    assert jnp.allclose(aw3, aw3_r, atol=1e-5, rtol=1e-5)

    # bf16-at-the-source path (halved encoder DMA + bf16 MXU); looser tolerance.
    hid_bf = hidden.astype(jnp.bfloat16)
    enc_bf = enc.astype(jnp.bfloat16)
    ctx4, aw4 = attention_pallas(hid_bf, enc_bf, W, bb, vv)
    jax.block_until_ready((ctx4, aw4))
    ctx4_r, aw4_r = attention_ref(hid_bf.astype(jnp.float32), enc_bf.astype(jnp.float32), W, bb, vv)
    assert jnp.allclose(ctx4, ctx4_r, atol=3e-2, rtol=3e-2)
    assert jnp.allclose(aw4, aw4_r, atol=3e-2, rtol=3e-2)

    print("KERNEL_OK")
</pallas_src>

<mosaic_0001>
module attributes {stable_mosaic.version = 11 : i64} {
  func.func @_attention_kernel(%arg0: i32, %arg1: memref<2x32xf32, #tpu.memory_space<vmem>>, %arg2: memref<2x8x32xf32, #tpu.memory_space<vmem>>, %arg3: memref<32x32xf32, #tpu.memory_space<vmem>>, %arg4: memref<32x32xf32, #tpu.memory_space<vmem>>, %arg5: memref<1x32xf32, #tpu.memory_space<vmem>>, %arg6: memref<1x32xf32, #tpu.memory_space<vmem>>, %arg7: memref<2x32xf32, #tpu.memory_space<vmem>>, %arg8: memref<2x8xf32, #tpu.memory_space<vmem>>) attributes {dimension_semantics = [#tpu.dimension_semantics<parallel>], iteration_bounds = array<i64: 1>, scalar_prefetch = 0 : i64, scratch_operands = 0 : i64, tpu.core_type = #tpu.core_type<tc>, window_params = [{transform_indices = @transform_0, window_bounds = array<i64: 2, 32>}, {transform_indices = @transform_1, window_bounds = array<i64: 2, 8, 32>}, {pipeline_mode = #tpu.pipeline_mode<synchronous>, transform_indices = @transform_2, window_bounds = array<i64: 32, 32>}, {pipeline_mode = #tpu.pipeline_mode<synchronous>, transform_indices = @transform_3, window_bounds = array<i64: 32, 32>}, {pipeline_mode = #tpu.pipeline_mode<synchronous>, transform_indices = @transform_4, window_bounds = array<i64: 1, 32>}, {pipeline_mode = #tpu.pipeline_mode<synchronous>, transform_indices = @transform_5, window_bounds = array<i64: 1, 32>}, {transform_indices = @transform_6, window_bounds = array<i64: 2, 32>}, {transform_indices = @transform_7, window_bounds = array<i64: 2, 8>}]} {
    %c0 = arith.constant 0 : index
    %c0_0 = arith.constant 0 : index
    %0 = vector.load %arg1[%c0, %c0_0] : memref<2x32xf32, #tpu.memory_space<vmem>>, vector<2x32xf32>
    %c0_1 = arith.constant 0 : index
    %c0_2 = arith.constant 0 : index
    %c0_3 = arith.constant 0 : index
    %1 = vector.load %arg2[%c0_1, %c0_2, %c0_3] : memref<2x8x32xf32, #tpu.memory_space<vmem>>, vector<2x8x32xf32>
    %c0_4 = arith.constant 0 : index
    %c0_5 = arith.constant 0 : index
    %2 = vector.load %arg3[%c0_4, %c0_5] : memref<32x32xf32, #tpu.memory_space<vmem>>, vector<32x32xf32>
    %c0_6 = arith.constant 0 : index
    %c0_7 = arith.constant 0 : index
    %3 = vector.load %arg4[%c0_6, %c0_7] : memref<32x32xf32, #tpu.memory_space<vmem>>, vector<32x32xf32>
    %c0_8 = arith.constant 0 : index
    %c0_9 = arith.constant 0 : index
    %4 = vector.load %arg5[%c0_8, %c0_9] : memref<1x32xf32, #tpu.memory_space<vmem>>, vector<1x32xf32>
    %c0_10 = arith.constant 0 : index
    %c0_11 = arith.constant 0 : index
    %5 = vector.load %arg6[%c0_10, %c0_11] : memref<1x32xf32, #tpu.memory_space<vmem>>, vector<1x32xf32>
    %cst = arith.constant dense<0.000000e+00> : vector<2x32xf32>
    %6 = tpu.matmul %0, %2, %cst {dimension_numbers = #tpu.dot_dimension_numbers<[1], [0], [0], [1], [0, 0, 1, 1], [], []>} : vector<2x32xf32>, vector<32x32xf32>, vector<2x32xf32> -> vector<2x32xf32>
    %7 = vector.broadcast %4 : vector<1x32xf32> to vector<2x32xf32>
    %8 = arith.addf %6, %7 : vector<2x32xf32>
    %9 = vector.shape_cast %1 : vector<2x8x32xf32> to vector<16x32xf32>
    %cst_12 = arith.constant dense<0.000000e+00> : vector<16x32xf32>
    %10 = tpu.matmul %9, %3, %cst_12 {dimension_numbers = #tpu.dot_dimension_numbers<[1], [0], [0], [1], [0, 0, 1, 1], [], []>} : vector<16x32xf32>, vector<32x32xf32>, vector<16x32xf32> -> vector<16x32xf32>
    %11 = vector.shape_cast %10 : vector<16x32xf32> to vector<2x8x32xf32>
    %12 = vector.shape_cast %8 : vector<2x32xf32> to vector<2x1x32xf32>
    %13 = vector.broadcast %12 : vector<2x1x32xf32> to vector<2x8x32xf32>
    %14 = arith.addf %11, %13 : vector<2x8x32xf32>
    %15 = math.tanh %14 : vector<2x8x32xf32>
    %16 = vector.shape_cast %5 : vector<1x32xf32> to vector<1x1x32xf32>
    %17 = vector.broadcast %16 : vector<1x1x32xf32> to vector<2x8x32xf32>
    %18 = arith.mulf %15, %17 : vector<2x8x32xf32>
    %cst_13 = arith.constant dense<0.000000e+00> : vector<2x8xf32>
    %19 = vector.multi_reduction <add>, %18, %cst_13 [2] : vector<2x8x32xf32> to vector<2x8xf32>
    %cst_14 = arith.constant dense<0xFF800000> : vector<2xf32>
    %20 = vector.multi_reduction <maximumf>, %19, %cst_14 [1] : vector<2x8xf32> to vector<2xf32>
    %21 = vector.shape_cast %20 : vector<2xf32> to vector<2x1xf32>
    %22 = vector.broadcast %21 : vector<2x1xf32> to vector<2x8xf32>
    %23 = arith.subf %19, %22 : vector<2x8xf32>
    %24 = math.exp %23 : vector<2x8xf32>
    %cst_15 = arith.constant dense<0.000000e+00> : vector<2xf32>
    %25 = vector.multi_reduction <add>, %24, %cst_15 [1] : vector<2x8xf32> to vector<2xf32>
    %26 = vector.shape_cast %25 : vector<2xf32> to vector<2x1xf32>
    %27 = vector.broadcast %26 : vector<2x1xf32> to vector<2x8xf32>
    %28 = arith.divf %24, %27 : vector<2x8xf32>
    %29 = vector.shape_cast %28 : vector<2x8xf32> to vector<2x8x1xf32>
    %30 = vector.broadcast %29 : vector<2x8x1xf32> to vector<2x8x32xf32>
    %31 = arith.mulf %1, %30 : vector<2x8x32xf32>
    %cst_16 = arith.constant dense<0.000000e+00> : vector<2x32xf32>
    %32 = vector.multi_reduction <add>, %31, %cst_16 [1] : vector<2x8x32xf32> to vector<2x32xf32>
    %c0_17 = arith.constant 0 : index
    %c0_18 = arith.constant 0 : index
    %33 = vector.load %arg7[%c0_17, %c0_18] : memref<2x32xf32, #tpu.memory_space<vmem>>, vector<2x32xf32>
    tpu.vector_store %arg7[%c0_17, %c0_18], %32 {strides = array<i32>} : memref<2x32xf32, #tpu.memory_space<vmem>>, vector<2x32xf32>,
    %c0_19 = arith.constant 0 : index
    %c0_20 = arith.constant 0 : index
    %34 = vector.load %arg8[%c0_19, %c0_20] : memref<2x8xf32, #tpu.memory_space<vmem>>, vector<2x8xf32>
    tpu.vector_store %arg8[%c0_19, %c0_20], %28 {strides = array<i32>} : memref<2x8xf32, #tpu.memory_space<vmem>>, vector<2x8xf32>,
    return
  }
  func.func @transform_0(%arg0: i32) -> (i32, i32) {
    %c0_i32 = arith.constant 0 : i32
    %c0_i32_0 = arith.constant 0 : i32
    return %arg0, %c0_i32 : i32, i32
  }
  func.func @transform_1(%arg0: i32) -> (i32, i32, i32) {
    %c0_i32 = arith.constant 0 : i32
    %c0_i32_0 = arith.constant 0 : i32
    %c0_i32_1 = arith.constant 0 : i32
    return %arg0, %c0_i32, %c0_i32_0 : i32, i32, i32
  }
  func.func @transform_2(%arg0: i32) -> (i32, i32) {
    %c0_i32 = arith.constant 0 : i32
    %c0_i32_0 = arith.constant 0 : i32
    %c0_i32_1 = arith.constant 0 : i32
    return %c0_i32, %c0_i32_0 : i32, i32
  }
  func.func @transform_3(%arg0: i32) -> (i32, i32) {
    %c0_i32 = arith.constant 0 : i32
    %c0_i32_0 = arith.constant 0 : i32
    %c0_i32_1 = arith.constant 0 : i32
    return %c0_i32, %c0_i32_0 : i32, i32
  }
  func.func @transform_4(%arg0: i32) -> (i32, i32) {
    %c0_i32 = arith.constant 0 : i32
    %c0_i32_0 = arith.constant 0 : i32
    %c0_i32_1 = arith.constant 0 : i32
    return %c0_i32, %c0_i32_0 : i32, i32
  }
  func.func @transform_5(%arg0: i32) -> (i32, i32) {
    %c0_i32 = arith.constant 0 : i32
    %c0_i32_0 = arith.constant 0 : i32
    %c0_i32_1 = arith.constant 0 : i32
    return %c0_i32, %c0_i32_0 : i32, i32
  }
  func.func @transform_6(%arg0: i32) -> (i32, i32) {
    %c0_i32 = arith.constant 0 : i32
    %c0_i32_0 = arith.constant 0 : i32
    return %arg0, %c0_i32 : i32, i32
  }
  func.func @transform_7(%arg0: i32) -> (i32, i32) {
    %c0_i32 = arith.constant 0 : i32
    %c0_i32_0 = arith.constant 0 : i32
    return %arg0, %c0_i32 : i32, i32
  }
}

</mosaic_0001>

<bundles_post_ra>
// kernel: tpu_custom_call.1
= control target key start
LH: loop header
LB: loop body
LE: loop exit
PB: predicated region body
PF: predicated region fallthrough
CT: control target
= control target key end

     0   :  { %13 = vsyncpa [#allocation3], 0  ;;  %s840_s0 = inlined_call_operand.hbm [shape: f32[2,32], index: 0, kind: input, shape index: {}]   ;;  %s841_s1 = inlined_call_operand.hbm [shape: f32[2,8,32], index: 1, kind: input, shape index: {}]   ;;  %s842_s2 = inlined_call_operand.hbm [shape: f32[32,32], index: 2, kind: input, shape index: {}]   ;;  %s843_s3 = inlined_call_operand.hbm [shape: f32[32,32], index: 3, kind: input, shape index: {}]   ;;  %s844_s4 = inlined_call_operand.vmem [shape: f32[1,32], index: 4, kind: input, shape index: {}]   ;;  %s845_s5 = inlined_call_operand.vmem [shape: f32[1,32], index: 5, kind: input, shape index: {}]   ;;  %s846_s6 = inlined_call_operand.hbm [shape: f32[2,32], index: 6, kind: output, shape index: {0}]   ;;  %s847_s7 = inlined_call_operand.hbm [shape: f32[2,8], index: 7, kind: output, shape index: {1}]  }
   0x1   :  { %14 = vsyncpa [#allocation6], 0 }
   0x2   :  { %15 = vsyncpa [#allocation9], 0 }
   0x3   :  { %16 = vsyncpa [#allocation4], 0 }
   0x4   :  { %17 = vsyncpa [#allocation12], 0  ;;  %s672_s24 = smov [#allocation5]   ;;  %s530_s28 = scalar_lea.hbm %s841_s1, 256 }
   0x5   :  { %s33_s25 = sshll.u32 %s672_s24, 4  ;;  %p531_p0 = scmp.ne.s32.totalorder %s841_s1, %s530_s28  ;;  %s34_s25 = int_to_ptr.vmem [resolvable:$true] %s33_s25 }
   0x6   :  { %p534_p1 = scmp.lt.u32.totalorder %s530_s28, %s841_s1 }
   0x8   :  { %p536_p2 = pnand %p534_p1, %p531_p0 }
   0xa   :  { %539 = shalt.err (!%p536_p2)
}
   0xb   :  { %s540_s10 = scalar_lea.vmem %s34_s25, 256  ;;  %p545_p4 = scmp.lt.s32.totalorder %s34_s25, %s34_s25 }
   0xc   :  { %p541_p3 = scmp.ne.s32.totalorder %s34_s25, %s540_s10  ;;  %p546_p5 = scmp.lt.s32.totalorder %s540_s10, %s540_s10 }
   0xe   :  { %p547_p6 = por %p546_p5, %p545_p4 }
  0x10   :  { %p548_p7 = pnand %p547_p6, %p541_p3 }
  0x12   :  { %551 = shalt.err (!%p548_p7)
}
  0x13   :  { %s673_s11 = smov 128   ;;  %s674_s12 = smov 8  }
  0x14   :  { %39 = dma.hbm_to_vmem [thread:$0]  %s841_s1, 256, %s34_s25, [#allocation6], %s673_s11, %s673_s11, %s674_s12  }
  0x15   :  { %s675_s15 = smov [#allocation2]   ;;  %s676_s17 = smov [#allocation7]  }
  0x16   :  { %s24_s16 = sshll.u32 %s675_s15, 4  ;;  %s45_s18 = sshll.u32 %s676_s17, 4  ;;  %s25_s16 = int_to_ptr.vmem [resolvable:$true] %s24_s16  ;;  %s46_s18 = int_to_ptr.vmem [resolvable:$true] %s45_s18 }
  0x17   :  { %s552_s21 = scalar_lea.hbm %s840_s0, 32 }
  0x18   :  { %p553_p8 = scmp.ne.s32.totalorder %s840_s0, %s552_s21  ;;  %p556_p9 = scmp.lt.u32.totalorder %s552_s21, %s840_s0 }
  0x1a   :  { %p558_p10 = pnand %p556_p9, %p553_p8 }
  0x1c   :  { %561 = shalt.err (!%p558_p10)
}
  0x1d   :  { %s562_s1 = scalar_lea.vmem %s25_s16, 32  ;;  %p567_p12 = scmp.lt.s32.totalorder %s25_s16, %s25_s16 }
  0x1e   :  { %p563_p11 = scmp.ne.s32.totalorder %s25_s16, %s562_s1  ;;  %p568_p13 = scmp.lt.s32.totalorder %s562_s1, %s562_s1 }
  0x20   :  { %p569_p0 = por %p568_p13, %p567_p12 }
  0x22   :  { %p570_p1 = pnand %p569_p0, %p563_p11 }
  0x24   :  { %573 = shalt.err (!%p570_p1)
}
  0x25   :  { %27 = dma.hbm_to_vmem [thread:$0]  %s840_s0, 32, %s25_s16, [#allocation3]  }
  0x26   :  { %s574_s30 = scalar_lea.hbm %s842_s2, 512 }
  0x27   :  { %p575_p2 = scmp.ne.s32.totalorder %s842_s2, %s574_s30  ;;  %p578_p3 = scmp.lt.u32.totalorder %s574_s30, %s842_s2 }
  0x29   :  { %p580_p4 = pnand %p578_p3, %p575_p2 }
  0x2b   :  { %583 = shalt.err (!%p580_p4)
}
  0x2c   :  { %s584_s14 = scalar_lea.vmem %s46_s18, 512  ;;  %p589_p6 = scmp.lt.s32.totalorder %s46_s18, %s46_s18 }
  0x2d   :  { %p585_p5 = scmp.ne.s32.totalorder %s46_s18, %s584_s14  ;;  %p590_p7 = scmp.lt.s32.totalorder %s584_s14, %s584_s14 }
  0x2f   :  { %p591_p8 = por %p590_p7, %p589_p6 }
  0x31   :  { %p592_p9 = pnand %p591_p8, %p585_p5 }
  0x33   :  { %595 = shalt.err (!%p592_p9)
}
  0x34   :  { %51 = dma.hbm_to_vmem [thread:$0]  %s842_s2, 512, %s46_s18, [#allocation6], %s673_s11, %s673_s11, %s674_s12  }
  0x35   :  { %s677_s16 = smov [#allocation8]   ;;  %s596_s21 = scalar_lea.hbm %s843_s3, 512 }
  0x36   :  { %s57_s17 = sshll.u32 %s677_s16, 4  ;;  %p597_p10 = scmp.ne.s32.totalorder %s843_s3, %s596_s21  ;;  %s58_s17 = int_to_ptr.vmem [resolvable:$true] %s57_s17 }
  0x37   :  { %p600_p11 = scmp.lt.u32.totalorder %s596_s21, %s843_s3 }
  0x39   :  { %p602_p12 = pnand %p600_p11, %p597_p10 }
  0x3b   :  { %605 = shalt.err (!%p602_p12)
}
  0x3c   :  { %s606_s1 = scalar_lea.vmem %s58_s17, 512  ;;  %p611_p0 = scmp.lt.s32.totalorder %s58_s17, %s58_s17 }
  0x3d   :  { %p607_p13 = scmp.ne.s32.totalorder %s58_s17, %s606_s1  ;;  %p612_p1 = scmp.lt.s32.totalorder %s606_s1, %s606_s1 }
  0x3f   :  { %p613_p2 = por %p612_p1, %p611_p0 }
  0x41   :  { %p614_p3 = pnand %p613_p2, %p607_p13 }
  0x43   :  { %617 = shalt.err (!%p614_p3)
}
  0x44   :  { %63 = dma.hbm_to_vmem [thread:$0]  %s843_s3, 512, %s58_s17, [#allocation9], %s673_s11, %s673_s11, %s674_s12  }
  0x45   :  { %662 = dma.done.wait [#allocation3], 32  }
  0x46   :  { %663 = vsyncadd [#allocation3], 4294967264 }
  0x47   :  { %664 = dma.done.wait [#allocation6], 768  }
  0x48   :  { %665 = vsyncadd [#allocation6], 4294966528 }
  0x49   :  { %666 = dma.done.wait [#allocation9], 512  }
  0x4a   :  { %667 = vsyncadd [#allocation9], 4294966784  ;;  %v678_v0 = vmov 0.0|0.0   ;;  %vm679_vm0 = vmmov 0   ;;  %v680_v1 = vmov 0.0   ;;  %v83_v2 = vld [vmem:[#allocation7] sm:$0xff]  ;;  %v258_v19 = vlaneseq }
  0x4b   :  { %489 = vmatprep.subr.bf16.mxu0 %v678_v0  ;;  %475 = vmatprep.mubr.msk.f32.mxu0 %vm679_vm0, %v680_v1  ;;  %v84_v3 = vld [vmem:[#allocation7 + $0x8] sm:$0xff]  ;;  %v85_v4 = vld [vmem:[#allocation7 + $0x10] sm:$0xff]  ;;  %v86_v6 = vld [vmem:[#allocation7 + $0x18] sm:$0xff]  ;;  %vm99_vm1 = vcmask 261120   ;;  %v681_v17 = vmov 1966171168  }
  0x4c   :  { %v490_v5 = vpack.c.bf16 %v84_v3, %v83_v2  ;;  %v87_v7 = vld [vmem:[#allocation8] sm:$0xff]  ;;  %v88_v8 = vld [vmem:[#allocation8 + $0x8] sm:$0xff]  ;;  %v89_v10 = vld [vmem:[#allocation8 + $0x10] sm:$0xff]  ;;  %v493_v12 = vpack.c.bf16 %v86_v6, %v85_v4  ;;  %v256_v18 = vunpack.c.l.s4 %v681_v17  ;;  %v791_v21 = vshrl.u32 %v258_v19, 7 }
  0x4d   :  { %v495_v9 = vpack.c.bf16 %v88_v8, %v87_v7  ;;  %v90_v11 = vld [vmem:[#allocation8 + $0x18] sm:$0xff]  ;;  %v782_v14 = vld [vmem:[#allocation5] sm:$0xff]  ;;  %v80_v15 = vld [vmem:[#allocation2] sm:$0x3]  ;;  %v308_v45 = vand.u32 127, %v258_v19  ;;  %vm317_vm2 = vcmask 1041409  }
  0x4e   :  { %491 = vmatpush3.bf16.msra.mxu0 %v490_v5  ;;  %v499_v13 = vpack.c.bf16 %v90_v11, %v89_v10  ;;  %486 = vmatprep.mubr.msk.f32.mxu1 %vm99_vm1, %v782_v14  ;;  %v786_v16 = vld [vmem:[#allocation5 + $0x8] sm:$0xff]  ;;  %v257_v20 = vunpack.c.0.s8 %v256_v18  ;;  %v451_v22 = vld [vmem:[%s844_s4] ss:$0 sm:$0xff]  ;;  %v279_v29 = vsub.s32 0, %v791_v21  ;;  %vm320_vm3 = vcmask 58368  }
  0x4f   :  { %492 = vmatprep.subr.bf16.mxu0 %v678_v0  ;;  %496 = vmatprep.subr.bf16.mxu1 %v495_v9  ;;  %v455_v38 = vld [vmem:[%s845_s5] ss:$0 sm:$0xff]  ;;  %v311_v47 = vsub.s32 %v308_v45, %v791_v21  ;;  %v682_v53 = vmov 0   ;;  %v331_v54 = vsub.s32 1, %v791_v21  ;;  %s683_s5 = smov [#allocation11]  }
  0x50   :  { %498 = vmatpush3.bf16.msra.mxu1 %v495_v9  ;;  %v260_v23 = vsub.s32 %v257_v20, %v791_v21  ;;  %517 = vset.pattern.permute.xlu0 %v682_v53  ;;  %s436_s25 = sshll.u32 %s683_s5, 4  ;;  %s437_s25 = int_to_ptr.vmem [resolvable:$true] %s436_s25 }
  0x51   :  { %500 = vmatprep.subr.bf16.mxu1 %v499_v13  ;;  %516 = vset.pattern.permute.xlu1 %v682_v53  ;;  %s618_s27 = scalar_lea.vmem %s437_s25, 32  ;;  %p623_p5 = scmp.lt.s32.totalorder %s437_s25, %s437_s25 }
  0x52   :  { %494 = vmatpush3.bf16.msra.mxu0 %v493_v12  ;;  %p619_p4 = scmp.ne.s32.totalorder %s437_s25, %s618_s27  ;;  %p624_p6 = scmp.lt.s32.totalorder %s618_s27, %s618_s27 }
  0x54   :  { %502 = vmatpush3.bf16.msra.mxu1 %v499_v13  ;;  %p625_p7 = por %p624_p6, %p623_p5 }
  0x55   :  { %476 = vmatmul.mubr.msk.f32.vlgmr.msra.gmra.mrb[0].mxu0 %vm99_vm1, %v80_v15 }
  0x56   :  { %p626_p8 = pnand %p625_p7, %p619_p4 }
  0x57   :  { %487 = vmatmul.mubr.msk.f32.vlgmr.msra.gmra.mrb[0].mxu1 %vm99_vm1, %v786_v16 }
 0x128   :  { %v169_v24 = vpop.f32.mrb[0].mxu0 }
 0x129   :  { %v170_v25 = vadd.f32 %v451_v22, %v169_v24  ;;  %v477_v26 = vpop.f32.mrb[1].mxu0 }
 0x12a   :  { %v488_v27 = vpop.f32.mrb[0].mxu1 }
 0x12b   :  { %v261_v28 = vrot.slane %v170_v25, %v260_v23  ;;  %v245_v30 = vpop.f32.mrb[1].mxu1 }
 0x12d   :  { %v262_v31 = vcombine.high %v261_v28, %v261_v28  ;;  %v269_v32 = vrot.slane %v261_v28, %v260_v23 }
 0x12f   :  { %v276_v33 = vrot.slane %v262_v31, %v260_v23  ;;  %v280_v34 = vrot.slane %v269_v32, %v279_v29 }
 0x131   :  { %v284_v35 = vrot.slane %v276_v33, %v279_v29  ;;  %v287_v36 = vadd.f32 %v280_v34, %v245_v30 }
 0x133   :  { %v288_v37 = vadd.f32 %v488_v27, %v284_v35  ;;  %518 = vtanh.f32 %v287_v36 }
 0x135   :  { %520 = vtanh.f32 %v288_v37 }
 0x13d   :  { %v519_v39 = vpop.eup %518 }
 0x13e   :  { %v297_v40 = vmul.f32 %v519_v39, %v455_v38 }
 0x13f   :  { %v521_v41 = vpop.eup %520 }
 0x140   :  { %v299_v42 = vsel %vm99_vm1, %v297_v40, 0.0  ;;  %v298_v43 = vmul.f32 %v521_v41, %v455_v38 }
 0x141   :  { %300 = vadd.xlane.f32.xlu0 %v299_v42 }
 0x142   :  { %v302_v44 = vsel %vm99_vm1, %v298_v43, 0.0 }
 0x145   :  { %303 = vadd.xlane.f32.xlu0 %v302_v44 }
 0x1ce   :  { %v301_v46 = vpop.xlane.xlu0 %300 }
 0x1cf   :  { %v312_v49 = vrot.slane %v301_v46, %v311_v47 }
 0x1d2   :  { %v304_v48 = vpop.xlane.xlu0 %303 }
 0x1d3   :  { %v316_v50 = vrot.slane %v304_v48, %v311_v47 }
 0x1d5   :  { %v318_v51 = vsel %vm317_vm2, %v316_v50, %v312_v49 }
 0x1d6   :  { %v321_v52 = vsel %vm320_vm3, %v318_v51, -inf }
 0x1d7   :  { %322 = vmax.xlane.f32.xlu1 %v321_v52 }
 0x264   :  { %v323_v55 = vpop.xlane.xlu1 %322 }
 0x265   :  { %v328_v56 = vrot.slane %v323_v55, %v279_v29  ;;  %v332_v57 = vrot.slane %v323_v55, %v331_v54 }
 0x267   :  { %v335_v58 = vsub.f32 %v301_v46, %v328_v56  ;;  %v336_v59 = vsub.f32 %v304_v48, %v332_v57 }
 0x269   :  { %v337_v60 = vmul.f32 1.442695, %v335_v58  ;;  %v339_v61 = vmul.f32 1.442695, %v336_v59 }
 0x26b   :  { %522 = vpow2.f32 %v337_v60 }
 0x26c   :  { %524 = vpow2.f32 %v339_v61 }
 0x275   :  { %v523_v62 = vpop.eup %522 }
 0x276   :  { %v525_v63 = vpop.eup %524  ;;  %344 = vperm.xlu1 %516, %v523_v62  }
 0x277   :  { %347 = vperm.xlu0 %517, %v525_v63  }
 0x2f5   :  { %v345_v0 = vpop.permute.xlu1 %344 }
 0x2f6   :  { %v348_v1 = vpop.permute.xlu0 %347  ;;  %v352_v2 = vrot.slane %v345_v0, %v311_v47 }
 0x2f7   :  { %v356_v3 = vrot.slane %v348_v1, %v311_v47 }
 0x2f9   :  { %v357_v4 = vsel %vm317_vm2, %v356_v3, %v352_v2 }
 0x2fa   :  { %v359_v5 = vsel %vm320_vm3, %v357_v4, 0.0 }
 0x2fb   :  { %360 = vadd.xlane.f32.xlu1 %v359_v5 }
 0x388   :  { %v361_v6 = vpop.xlane.xlu1 %360 }
 0x389   :  { %v366_v7 = vrot.slane %v361_v6, %v279_v29  ;;  %v370_v8 = vrot.slane %v361_v6, %v331_v54 }
 0x38b   :  { %526 = vrcp.f32 %v366_v7 }
 0x38c   :  { %528 = vrcp.f32 %v370_v8 }
 0x395   :  { %v527_v9 = vpop.eup %526 }
 0x396   :  { %v374_v10 = vmul.f32 %v527_v9, %v523_v62  ;;  %v529_v11 = vpop.eup %528 }
 0x397   :  { %v376_v12 = vmul.f32 %v529_v11, %v525_v63 }
 0x398   :  { %379 = vperm.xlu0 %517, %v374_v10  }
 0x39c   :  { %384 = vperm.xlu0 %517, %v376_v12  }
 0x417   :  { %v380_v13 = vpop.permute.xlu0 %379 }
 0x418   :  { %v387_v15 = vmul.f32 %v380_v13, %v782_v14  ;;  %v412_v20 = vrot.slane %v380_v13, %v311_v47 }
 0x41a   :  { %v389_v17 = vsel %vm99_vm1, %v387_v15, 0.0 }
 0x41b   :  { %v390_v18 = vrot.slane %v389_v17, 4  ;;  %v385_v19 = vpop.permute.xlu0 %384 }
 0x41c   :  { %v388_v21 = vmul.f32 %v385_v19, %v786_v16  ;;  %v416_v22 = vrot.slane %v385_v19, %v311_v47 }
 0x41d   :  { %v391_v23 = vadd.f32 %v390_v18, %v389_v17 }
 0x41e   :  { %v396_v24 = vsel %vm99_vm1, %v388_v21, 0.0  ;;  %v417_v25 = vsel %vm317_vm2, %v416_v22, %v412_v20 }
 0x41f   :  { %v392_v26 = vrot.slane %v391_v23, 2  ;;  %v397_v27 = vrot.slane %v396_v24, 4  ;;  %419 = vst.msk [vmem:[#allocation11] sm:$0x3] %vm320_vm3, %v417_v25 }
 0x420   :  { %629 = shalt.err (!%p626_p8)
}
 0x421   :  { %s630_s30 = scalar_lea.hbm %s847_s7, 32 }
 0x422   :  { %p631_p9 = scmp.ne.s32.totalorder %s847_s7, %s630_s30  ;;  %p634_p10 = scmp.lt.u32.totalorder %s630_s30, %s847_s7 }
 0x424   :  { %p636_p11 = pnand %p634_p10, %p631_p9 }
 0x426   :  { %639 = shalt.err (!%p636_p11)
}
 0x427   :  { %439 = dma.vmem_to_hbm [thread:$0]  %s437_s25, 32, %s847_s7, [#allocation12]   ;;  %v393_v14 = vadd.f32 %v392_v26, %v391_v23  ;;  %v398_v16 = vadd.f32 %v397_v27, %v396_v24  ;;  %vm407_vm4 = vcmask 254976  }
 0x428   :  { %s684_s15 = smov [#allocation10]  }
 0x429   :  { %v399_v28 = vrot.slane %v398_v16, 2  ;;  %v394_v29 = vrot.slane %v393_v14, 1  ;;  %s426_s16 = sshll.u32 %s684_s15, 4  ;;  %s427_s16 = int_to_ptr.vmem [resolvable:$true] %s426_s16 }
 0x42a   :  { %s640_s17 = scalar_lea.vmem %s427_s16, 32  ;;  %p645_p13 = scmp.lt.s32.totalorder %s427_s16, %s427_s16 }
 0x42b   :  { %v400_v30 = vadd.f32 %v399_v28, %v398_v16  ;;  %v395_v33 = vadd.f32 %v394_v29, %v393_v14  ;;  %p641_p12 = scmp.ne.s32.totalorder %s427_s16, %s640_s17  ;;  %p646_p0 = scmp.lt.s32.totalorder %s640_s17, %s640_s17 }
 0x42d   :  { %v401_v31 = vrot.slane %v400_v30, 1  ;;  %p647_p1 = por %p646_p0, %p645_p13 }
 0x42f   :  { %v402_v32 = vadd.f32 %v401_v31, %v400_v30  ;;  %p648_p2 = pnand %p647_p1, %p641_p12 }
 0x431   :  { %v405_v34 = vsel %vm317_vm2, %v402_v32, %v395_v33 }
 0x432   :  { %408 = vst.msk [vmem:[#allocation10] sm:$0x3] %vm407_vm4, %v405_v34 }
 0x433   :  { %651 = shalt.err (!%p648_p2)
}
 0x434   :  { %s652_s20 = scalar_lea.hbm %s846_s6, 32 }
 0x435   :  { %p653_p3 = scmp.ne.s32.totalorder %s846_s6, %s652_s20  ;;  %p656_p4 = scmp.lt.u32.totalorder %s652_s20, %s846_s6 }
 0x437   :  { %p658_p5 = pnand %p656_p4, %p653_p3 }
 0x439   :  { %661 = shalt.err (!%p658_p5)
}
 0x43a   :  { %429 = dma.vmem_to_hbm [thread:$0]  %s427_s16, 32, %s846_s6, [#allocation4]  }
 0x43b   :  { %668 = dma.done.wait [#allocation4], 32  }
 0x43c   :  { %669 = vsyncadd [#allocation4], 4294967264 }
 0x43d   :  { %670 = dma.done.wait [#allocation12], 32  }
 0x43e   :  { %671 = vsyncadd [#allocation12], 4294967264 }
 0x43f   :  { %446 = vsyncpa [#allocation3], 1 }
 0x440   :  { %447 = vsyncpa [#allocation6], 1 }
 0x441   :  { %448 = vsyncpa [#allocation9], 1 }
 0x442   :  { %449 = vsyncpa [#allocation4], 1 }
 0x443   :  { %450 = vsyncpa [#allocation12], 1 }

</bundles_post_ra>
